<compile_context>
chip_gen: v6e
topology: v6e:2x2x1
jax: 0.10.0
libtpu: 0.0.40
codegen_flags: <defaults>
</compile_context>

<pallas_src>
import jax
import jax.numpy as jnp
from jax.experimental import pallas as pl
from jax.experimental.pallas import tpu as pltpu

# ----------------------------- sizes (module constants) ----------------------
H = 32                   # hidden_size
E = 64                   # embedding_dim (fixed by the module)
V = 40                   # output_vocab_size (len(vocab) + 3, synthetic)
VP = 64                  # logits slot padded to a lane-friendly width
LANES = 128              # lane width of every slab

ONE_LANE = E + H         # 96: constant-1 lane in the acts slab -> folded gate bias
ROW_W1 = 0               # fused [x | ctx | 1] gate weight rows   [0, 128)
ROW_WH = 4 * H           # W_hh.T rows                            [128, 160)
ROW_WOUT = ROW_WH + H    # extended output-projection rows        [160, 192)
ROW_BOUT = ROW_WOUT + H  # output bias row                        192
W_ROWS = ROW_BOUT + 8    # weight slab padded to 8-sublane multiple -> 200


# ----------------------------- Pallas kernel ---------------------------------
def decoder_kernel(acts_ref, hc0_ref, w_ref, out_ref, h_scr, c_scr):
    t = pl.program_id(0)

    # Load the initial hidden/cell state into the VMEM carry on the first step.
    @pl.when(t == 0)
    def _():
        h_scr[...] = hc0_ref[:, :H]
        c_scr[...] = hc0_ref[:, H:]

    acts = acts_ref[...]            # (B, 128): [x(64) | context(32) | 1 | 0...]
    h = h_scr[...]                  # (B, H)
    c = c_scr[...]                  # (B, H)

    # LSTM gates; the gate bias is folded into w1 via the constant-1 lane.
    gates = (
        jnp.dot(acts, w_ref[ROW_W1:ROW_W1 + LANES, :],
                preferred_element_type=jnp.float32)
        + jnp.dot(h, w_ref[ROW_WH:ROW_WH + H, :],
                  preferred_element_type=jnp.float32)
    )                                                        # (B, 4H)

    i_g = jax.nn.sigmoid(gates[:, 0 * H:1 * H])
    f_g = jax.nn.sigmoid(gates[:, 1 * H:2 * H])
    g_g = jnp.tanh(gates[:, 2 * H:3 * H])
    o_g = jax.nn.sigmoid(gates[:, 3 * H:4 * H])

    c_new = f_g * c + i_g * g_g
    h_new = o_g * jnp.tanh(c_new)
    h_scr[...] = h_new
    c_scr[...] = c_new

    # Output projection; the identity block in the weight places h_new at
    # lanes [VP, VP+H), so the write is one full 128-lane store + one masked
    # store for c_new (no lane concatenate).
    out_vec = (jnp.dot(h_new, w_ref[ROW_WOUT:ROW_WOUT + H, :],
                       preferred_element_type=jnp.float32)
               + w_ref[ROW_BOUT:ROW_BOUT + 1, :])            # (B, 128)
    out_ref[...] = out_vec
    out_ref[:, VP + H:] = c_new


# ----------------------------- one-time weight prepack ------------------------
def prepack_params(params):
    """Hoisted out of the decode loop: transpose/fuse/pad all weights once."""
    w_ih_t = params["W_ih"].T.astype(jnp.float32)            # (E+H, 4H) = (96, 128)
    w_hh_t = params["W_hh"].T.astype(jnp.float32)            # (H, 4H)   = (32, 128)
    b_gates = (params["b_ih"] + params["b_hh"]).astype(jnp.float32)   # (4H,)

    # Fused gate weight matching the acts layout [x | context | 1 | 0].
    w1 = jnp.zeros((LANES, 4 * H), jnp.float32)
    w1 = w1.at[:E + H, :].set(w_ih_t)          # x rows + context rows
    w1 = w1.at[ONE_LANE, :].set(b_gates)       # bias row (driven by constant-1 lane)

    # Output projection extended with an identity block that emits h_new.
    w_out_ext = jnp.zeros((H, LANES), jnp.float32)
    w_out_ext = w_out_ext.at[:, :V].set(params["W_out"].T.astype(jnp.float32))
    w_out_ext = w_out_ext.at[:, VP:VP + H].set(jnp.eye(H, dtype=jnp.float32))

    b_out_row = jnp.zeros((1, LANES), jnp.float32).at[0, :V].set(
        params["b_out"].astype(jnp.float32))

    pad = jnp.zeros((W_ROWS - (ROW_BOUT + 1), LANES), jnp.float32)
    w_slab = jnp.concatenate([w1, w_hh_t, w_out_ext, b_out_row, pad], axis=0)
    return {"emb": params["emb"].astype(jnp.float32), "w_slab": w_slab}


# ----------------------------- wrapper (glue) ---------------------------------
def decoder_forward(input_seq, hidden, encoder_output, packed):
    """Runs the Decoder forward for every step of input_seq, carrying hidden.

    input_seq: (T, B) int32; hidden: ((1,B,H), (1,B,H)); encoder_output: (S,B,H).
    Each step is identical to the torch module's single-step forward.
    Returns (logits (T,B,V), (h (1,B,H), c (1,B,H))).
    """
    h0, c0 = hidden
    T, B = input_seq.shape

    # Attention: softmax over a size-1 axis == 1.0, so the weighted context is
    # exactly encoder_output.sum(0); it does not depend on the decoder hidden
    # state and is therefore constant across all decode steps.
    context = jnp.sum(encoder_output, axis=0).astype(jnp.float32)       # (B, H)

    # One embedding gather for the whole token sequence (dropout = identity).
    emb = packed["emb"][input_seq]                                       # (T, B, E)

    acts = jnp.concatenate(
        [emb,
         jnp.broadcast_to(context[None], (T, B, H)),
         jnp.ones((T, B, 1), jnp.float32),            # drives the folded gate bias
         jnp.zeros((T, B, LANES - ONE_LANE - 1), jnp.float32)],
        axis=-1)                                                         # (T, B, 128)
    hc0 = jnp.concatenate([h0[0], c0[0]], axis=-1)                       # (B, 2H)

    out_slab = pl.pallas_call(
        decoder_kernel,
        out_shape=jax.ShapeDtypeStruct((T, B, LANES), jnp.float32),
        grid_spec=pltpu.PrefetchScalarGridSpec(
            num_scalar_prefetch=0,
            grid=(T,),
            in_specs=[
                # per-step activation block: the only input that moves per step
                pl.BlockSpec((None, B, LANES), lambda t: (t, 0, 0)),
                # initial hidden/cell state: fetched once
                pl.BlockSpec((B, 2 * H), lambda t: (0, 0)),
                # all weights + biases in one slab: fetched once, VMEM-resident
                pl.BlockSpec((W_ROWS, LANES), lambda t: (0, 0)),
            ],
            out_specs=pl.BlockSpec((None, B, LANES), lambda t: (t, 0, 0)),
            scratch_shapes=[pltpu.VMEM((B, H), jnp.float32),   # h carry
                            pltpu.VMEM((B, H), jnp.float32)],  # c carry
        ),
        compiler_params=pltpu.CompilerParams(
            dimension_semantics=("arbitrary",)),   # sequential h/c dependence
    )(acts, hc0, packed["w_slab"])

    logits = out_slab[:, :, :V]                    # (T, B, V)
    h_n = out_slab[-1, :, VP:VP + H][None]         # (1, B, H)
    c_n = out_slab[-1, :, VP + H:][None]           # (1, B, H)
    return logits, (h_n, c_n)


# ----------------------------- pure-JAX reference (full attention path) -------
def reference_step(tokens, h, c, encoder_output, params):
    """One torch-faithful Decoder.forward step (full attention, no elision)."""
    emb = params["emb"][tokens]                                      # (B, E)
    Sn, Bn, Hn = encoder_output.shape
    dh = jnp.broadcast_to(h[None], (Sn, Bn, Hn))
    combined = jnp.concatenate([encoder_output, dh], axis=2)         # (S, B, 2H)
    energy = jnp.tanh(combined @ params["W_in"].T + params["b_in"])  # (S, B, H)
    score = jax.nn.softmax(energy @ params["v_w"].T, axis=2)         # (S, B, 1)
    score_b = jnp.transpose(score, (1, 2, 0))                        # (B, 1, S)
    enc_b = jnp.transpose(encoder_output, (1, 0, 2))                 # (B, S, H)
    ctx = jnp.einsum("bos,bsh->boh", score_b, enc_b)[:, 0, :]        # (B, H)
    x = jnp.concatenate([emb, ctx], axis=1)                          # (B, E+H)
    gates = (x @ params["W_ih"].T + params["b_ih"]
             + h @ params["W_hh"].T + params["b_hh"])
    i = jax.nn.sigmoid(gates[:, :Hn])
    f = jax.nn.sigmoid(gates[:, Hn:2 * Hn])
    g = jnp.tanh(gates[:, 2 * Hn:3 * Hn])
    o = jax.nn.sigmoid(gates[:, 3 * Hn:4 * Hn])
    c_new = f * c + i * g
    h_new = o * jnp.tanh(c_new)
    logits = h_new @ params["W_out"].T + params["b_out"]
    return logits, h_new, c_new


# ----------------------------- main -------------------------------------------
if __name__ == "__main__":
    key = jax.random.PRNGKey(0)
    ks = jax.random.split(key, 16)

    def u(k, shape, s=0.1):
        return jax.random.uniform(k, shape, jnp.float32, -s, s)

    params = {
        "emb":   u(ks[0], (V, E)),
        "W_in":  u(ks[1], (H, 2 * H)),     "b_in":  u(ks[2], (H,)),
        "v_w":   u(ks[3], (1, H)),
        "W_ih":  u(ks[4], (4 * H, E + H)), "b_ih":  u(ks[5], (4 * H,)),
        "W_hh":  u(ks[6], (4 * H, H)),     "b_hh":  u(ks[7], (4 * H,)),
        "W_out": u(ks[8], (V, H)),         "b_out": u(ks[9], (V,)),
    }

    T, B, S = 4, 8, 8    # decode steps, batch (fills all 8 sublanes), enc length
    input_seq = jax.random.randint(ks[10], (T, B), 0, V, jnp.int32)
    h0 = jax.random.normal(ks[11], (1, B, H), jnp.float32) * 0.5
    c0 = jax.random.normal(ks[12], (1, B, H), jnp.float32) * 0.5
    encoder_output = jax.random.normal(ks[13], (S, B, H), jnp.float32) * 0.5

    packed = prepack_params(params)   # one-time weight prepack (per model)

    logits, (h_n, c_n) = decoder_forward(input_seq, (h0, c0), encoder_output, packed)
    jax.block_until_ready((logits, h_n, c_n))

    # Reference: repeated application of the module's single-step forward.
    h_ref, c_ref = h0[0], c0[0]
    ref_logits = []
    for t in range(T):
        lt, h_ref, c_ref = reference_step(input_seq[t], h_ref, c_ref,
                                          encoder_output, params)
        ref_logits.append(lt)
    ref_logits = jnp.stack(ref_logits)                                  # (T, B, V)

    assert logits.shape == (T, B, V)
    assert h_n.shape == (1, B, H) and c_n.shape == (1, B, H)
    assert jnp.allclose(logits, ref_logits, rtol=1e-3, atol=1e-3)
    assert jnp.allclose(h_n[0], h_ref, rtol=1e-3, atol=1e-3)
    assert jnp.allclose(c_n[0], c_ref, rtol=1e-3, atol=1e-3)

    print("KERNEL_OK")
</pallas_src>

<mosaic_0001>
module attributes {stable_mosaic.version = 11 : i64} {
  func.func @decoder_kernel(%arg0: i32, %arg1: memref<1x8x128xf32, #tpu.memory_space<vmem>>, %arg2: memref<8x64xf32, #tpu.memory_space<vmem>>, %arg3: memref<200x128xf32, #tpu.memory_space<vmem>>, %arg4: memref<1x8x128xf32, #tpu.memory_space<vmem>>, %arg5: memref<8x32xf32, #tpu.memory_space<vmem>>, %arg6: memref<8x32xf32, #tpu.memory_space<vmem>>) attributes {dimension_semantics = [#tpu.dimension_semantics<arbitrary>], iteration_bounds = array<i64: 4>, scalar_prefetch = 0 : i64, scratch_operands = 2 : i64, tpu.core_type = #tpu.core_type<tc>, window_params = [{transform_indices = @transform_0, window_bounds = array<i64: 1, 8, 128>}, {pipeline_mode = #tpu.pipeline_mode<synchronous>, transform_indices = @transform_1, window_bounds = array<i64: 8, 64>}, {pipeline_mode = #tpu.pipeline_mode<synchronous>, transform_indices = @transform_2, window_bounds = array<i64: 200, 128>}, {transform_indices = @transform_3, window_bounds = array<i64: 1, 8, 128>}]} {
    %c0_i32 = arith.constant 0 : i32
    %0 = arith.cmpi eq, %arg0, %c0_i32 : i32
    %1 = arith.extui %0 : i1 to i32
    %c0_i32_0 = arith.constant 0 : i32
    %2 = arith.cmpi ne, %1, %c0_i32_0 : i32
    scf.if %2 {
      %c0_26 = arith.constant 0 : index
      %c0_27 = arith.constant 0 : index
      %50 = vector.load %arg2[%c0_26, %c0_27] : memref<8x64xf32, #tpu.memory_space<vmem>>, vector<8x32xf32>
      %c0_28 = arith.constant 0 : index
      %c0_29 = arith.constant 0 : index
      %51 = vector.load %arg5[%c0_28, %c0_29] : memref<8x32xf32, #tpu.memory_space<vmem>>, vector<8x32xf32>
      tpu.vector_store %arg5[%c0_28, %c0_29], %50 {strides = array<i32>} : memref<8x32xf32, #tpu.memory_space<vmem>>, vector<8x32xf32>,
      %c0_30 = arith.constant 0 : index
      %c32 = arith.constant 32 : index
      %52 = vector.load %arg2[%c0_30, %c32] : memref<8x64xf32, #tpu.memory_space<vmem>>, vector<8x32xf32>
      %c0_31 = arith.constant 0 : index
      %c0_32 = arith.constant 0 : index
      %53 = vector.load %arg6[%c0_31, %c0_32] : memref<8x32xf32, #tpu.memory_space<vmem>>, vector<8x32xf32>
      tpu.vector_store %arg6[%c0_31, %c0_32], %52 {strides = array<i32>} : memref<8x32xf32, #tpu.memory_space<vmem>>, vector<8x32xf32>,
    } else {
    }
    %c0 = arith.constant 0 : index
    %c0_1 = arith.constant 0 : index
    %c0_2 = arith.constant 0 : index
    %3 = vector.load %arg1[%c0, %c0_1, %c0_2] : memref<1x8x128xf32, #tpu.memory_space<vmem>>, vector<1x8x128xf32>
    %4 = vector.shape_cast %3 : vector<1x8x128xf32> to vector<8x128xf32>
    %c0_3 = arith.constant 0 : index
    %c0_4 = arith.constant 0 : index
    %5 = vector.load %arg5[%c0_3, %c0_4] : memref<8x32xf32, #tpu.memory_space<vmem>>, vector<8x32xf32>
    %c0_5 = arith.constant 0 : index
    %c0_6 = arith.constant 0 : index
    %6 = vector.load %arg6[%c0_5, %c0_6] : memref<8x32xf32, #tpu.memory_space<vmem>>, vector<8x32xf32>
    %c0_7 = arith.constant 0 : index
    %c0_8 = arith.constant 0 : index
    %7 = vector.load %arg3[%c0_7, %c0_8] : memref<200x128xf32, #tpu.memory_space<vmem>>, vector<128x128xf32>
    %cst = arith.constant dense<0.000000e+00> : vector<8x128xf32>
    %8 = tpu.matmul %4, %7, %cst {dimension_numbers = #tpu.dot_dimension_numbers<[1], [0], [0], [1], [0, 0, 1, 1], [], []>} : vector<8x128xf32>, vector<128x128xf32>, vector<8x128xf32> -> vector<8x128xf32>
    %c128 = arith.constant 128 : index
    %c0_9 = arith.constant 0 : index
    %9 = vector.load %arg3[%c128, %c0_9] : memref<200x128xf32, #tpu.memory_space<vmem>>, vector<32x128xf32>
    %cst_10 = arith.constant dense<0.000000e+00> : vector<8x128xf32>
    %10 = tpu.matmul %5, %9, %cst_10 {dimension_numbers = #tpu.dot_dimension_numbers<[1], [0], [0], [1], [0, 0, 1, 1], [], []>} : vector<8x32xf32>, vector<32x128xf32>, vector<8x128xf32> -> vector<8x128xf32>
    %11 = arith.addf %8, %10 : vector<8x128xf32>
    %12 = vector.extract_strided_slice %11 {offsets = [0, 0], sizes = [8, 32], strides = [1, 1]} : vector<8x128xf32> to vector<8x32xf32>
    %13 = arith.negf %12 : vector<8x32xf32>
    %14 = math.exp %13 : vector<8x32xf32>
    %cst_11 = arith.constant 1.000000e+00 : f32
    %15 = vector.broadcast %cst_11 : f32 to vector<8x32xf32>
    %16 = arith.addf %15, %14 : vector<8x32xf32>
    %17 = arith.divf %15, %16 : vector<8x32xf32>
    %18 = vector.extract_strided_slice %11 {offsets = [0, 32], sizes = [8, 32], strides = [1, 1]} : vector<8x128xf32> to vector<8x32xf32>
    %19 = arith.negf %18 : vector<8x32xf32>
    %20 = math.exp %19 : vector<8x32xf32>
    %cst_12 = arith.constant 1.000000e+00 : f32
    %21 = vector.broadcast %cst_12 : f32 to vector<8x32xf32>
    %22 = arith.addf %21, %20 : vector<8x32xf32>
    %23 = arith.divf %21, %22 : vector<8x32xf32>
    %24 = vector.extract_strided_slice %11 {offsets = [0, 64], sizes = [8, 32], strides = [1, 1]} : vector<8x128xf32> to vector<8x32xf32>
    %25 = math.tanh %24 : vector<8x32xf32>
    %26 = vector.extract_strided_slice %11 {offsets = [0, 96], sizes = [8, 32], strides = [1, 1]} : vector<8x128xf32> to vector<8x32xf32>
    %27 = arith.negf %26 : vector<8x32xf32>
    %28 = math.exp %27 : vector<8x32xf32>
    %cst_13 = arith.constant 1.000000e+00 : f32
    %29 = vector.broadcast %cst_13 : f32 to vector<8x32xf32>
    %30 = arith.addf %29, %28 : vector<8x32xf32>
    %31 = arith.divf %29, %30 : vector<8x32xf32>
    %32 = arith.mulf %23, %6 : vector<8x32xf32>
    %33 = arith.mulf %17, %25 : vector<8x32xf32>
    %34 = arith.addf %32, %33 : vector<8x32xf32>
    %35 = math.tanh %34 : vector<8x32xf32>
    %36 = arith.mulf %31, %35 : vector<8x32xf32>
    %c0_14 = arith.constant 0 : index
    %c0_15 = arith.constant 0 : index
    %37 = vector.load %arg5[%c0_14, %c0_15] : memref<8x32xf32, #tpu.memory_space<vmem>>, vector<8x32xf32>
    tpu.vector_store %arg5[%c0_14, %c0_15], %36 {strides = array<i32>} : memref<8x32xf32, #tpu.memory_space<vmem>>, vector<8x32xf32>,
    %c0_16 = arith.constant 0 : index
    %c0_17 = arith.constant 0 : index
    %38 = vector.load %arg6[%c0_16, %c0_17] : memref<8x32xf32, #tpu.memory_space<vmem>>, vector<8x32xf32>
    tpu.vector_store %arg6[%c0_16, %c0_17], %34 {strides = array<i32>} : memref<8x32xf32, #tpu.memory_space<vmem>>, vector<8x32xf32>,
    %c160 = arith.constant 160 : index
    %c0_18 = arith.constant 0 : index
    %39 = vector.load %arg3[%c160, %c0_18] : memref<200x128xf32, #tpu.memory_space<vmem>>, vector<32x128xf32>
    %cst_19 = arith.constant dense<0.000000e+00> : vector<8x128xf32>
    %40 = tpu.matmul %36, %39, %cst_19 {dimension_numbers = #tpu.dot_dimension_numbers<[1], [0], [0], [1], [0, 0, 1, 1], [], []>} : vector<8x32xf32>, vector<32x128xf32>, vector<8x128xf32> -> vector<8x128xf32>
    %c192 = arith.constant 192 : index
    %c0_20 = arith.constant 0 : index
    %41 = vector.load %arg3[%c192, %c0_20] : memref<200x128xf32, #tpu.memory_space<vmem>>, vector<1x128xf32>
    %42 = vector.broadcast %41 : vector<1x128xf32> to vector<8x128xf32>
    %43 = arith.addf %40, %42 : vector<8x128xf32>
    %c0_21 = arith.constant 0 : index
    %c0_22 = arith.constant 0 : index
    %c0_23 = arith.constant 0 : index
    %44 = vector.load %arg4[%c0_21, %c0_22, %c0_23] : memref<1x8x128xf32, #tpu.memory_space<vmem>>, vector<1x8x128xf32>
    %45 = vector.shape_cast %44 : vector<1x8x128xf32> to vector<8x128xf32>
    %46 = vector.shape_cast %43 : vector<8x128xf32> to vector<1x8x128xf32>
    tpu.vector_store %arg4[%c0_21, %c0_22, %c0_23], %46 {strides = array<i32>} : memref<1x8x128xf32, #tpu.memory_space<vmem>>, vector<1x8x128xf32>,
    %c0_24 = arith.constant 0 : index
    %c0_25 = arith.constant 0 : index
    %c96 = arith.constant 96 : index
    %47 = vector.load %arg4[%c0_24, %c0_25, %c96] : memref<1x8x128xf32, #tpu.memory_space<vmem>>, vector<1x8x32xf32>
    %48 = vector.shape_cast %47 : vector<1x8x32xf32> to vector<8x32xf32>
    %49 = vector.shape_cast %34 : vector<8x32xf32> to vector<1x8x32xf32>
    tpu.vector_store %arg4[%c0_24, %c0_25, %c96], %49 {strides = array<i32>} : memref<1x8x128xf32, #tpu.memory_space<vmem>>, vector<1x8x32xf32>,
    return
  }
  func.func @transform_0(%arg0: i32) -> (i32, i32, i32) {
    %c0_i32 = arith.constant 0 : i32
    %c0_i32_0 = arith.constant 0 : i32
    %c0_i32_1 = arith.constant 0 : i32
    return %arg0, %c0_i32, %c0_i32_0 : i32, i32, i32
  }
  func.func @transform_1(%arg0: i32) -> (i32, i32) {
    %c0_i32 = arith.constant 0 : i32
    %c0_i32_0 = arith.constant 0 : i32
    %c0_i32_1 = arith.constant 0 : i32
    return %c0_i32, %c0_i32_0 : i32, i32
  }
  func.func @transform_2(%arg0: i32) -> (i32, i32) {
    %c0_i32 = arith.constant 0 : i32
    %c0_i32_0 = arith.constant 0 : i32
    %c0_i32_1 = arith.constant 0 : i32
    return %c0_i32, %c0_i32_0 : i32, i32
  }
  func.func @transform_3(%arg0: i32) -> (i32, i32, i32) {
    %c0_i32 = arith.constant 0 : i32
    %c0_i32_0 = arith.constant 0 : i32
    %c0_i32_1 = arith.constant 0 : i32
    return %arg0, %c0_i32, %c0_i32_0 : i32, i32, i32
  }
}

</mosaic_0001>

<bundles_post_ra>
// kernel: tpu_custom_call.1
= control target key start
LH: loop header
LB: loop body
LE: loop exit
PB: predicated region body
PF: predicated region fallthrough
CT: control target
= control target key end

     0   :  { %8 = vsyncpa [#allocation5], 0  ;;  %s1217_s0 = inlined_call_operand.hbm [shape: f32[4,8,128], index: 0, kind: input, shape index: {}]   ;;  %s1218_s1 = inlined_call_operand.hbm [shape: f32[8,64], index: 1, kind: input, shape index: {}]   ;;  %s1219_s2 = inlined_call_operand.hbm [shape: f32[200,128], index: 2, kind: input, shape index: {}]   ;;  %s1220_s3 = inlined_call_operand.hbm [shape: f32[4,8,128], index: 3, kind: output, shape index: {}]  }
   0x1   :  { %10 = vsyncpa [#allocation5 + $0x1], 0 }
   0x2   :  { %11 = vsyncpa [#allocation8], 0 }
   0x3   :  { %12 = vsyncpa [#allocation6], 0 }
   0x4   :  { %14 = vsyncpa [#allocation6 + $0x1], 0  ;;  %s991_s12 = smov 0   ;;  %s993_s13 = smov 0  }
   0x5   :  { %s995_s14 = smov 0   ;;  %s997_s15 = smov 0  }
   0x6 LB: > { %s1012_s16 = sadd.s32 4294967295, %s957_s15   ;;  %s621_s17 = sadd.s32 4294967294, %s957_s15   ;;  %s957_s15 = sphi %s997_s15, %s1242_s15   ;;  %s953_s14 = sphi %s995_s14, %s1241_s14   ;;  %s949_s13 = sphi %s993_s13, %s1240_s13   ;;  %s945_s12 = sphi %s991_s12, %s1239_s12  }
   0x7   : > { %p40_p0 = scmp.ne.s32.totalorder %s949_s13, %s945_s12  ;;  %p1221_p1 = scmp.eq.s32.totalorder %s1012_s16, 0 }
   0x8   : > { %p112_p3 = scmp.eq.s32.totalorder %s621_s17, 3  ;;  %p622_p5 = scmp.ge.s32.totalorder %s957_s15, 1 }
   0x9   : > { %p1021_p4 = por %p1221_p1, %p40_p0  ;;  %p119_p7 = scmp.lt.s32.totalorder %s957_s15, 5 }
   0xa   : > { %p1026_p6 = por %p112_p3, %p40_p0  ;;  %s959_s21 = smov [#allocation7]  }
   0xb   : > { %s1225_s18 = scalar_select %p1021_p4, 1, 0 }
   0xc   : > { %s1226_s19 = scalar_select %p1026_p6, 1, 0 }
   0xd   : > { %p1032_p9 = pnand %p622_p5, %p119_p7  ;;  %s132_s22 = sshll.u32 %s959_s21, 4  ;;  %s133_s22 = int_to_ptr.vmem [resolvable:$true] %s132_s22 }
   0xe   : > { %s960_s23 = smov [#allocation9]   ;;  %s820_s26 = scalar_lea.vmem %s133_s22, 128 }
   0xf   : > { %s1227_s20 = scalar_select %p1032_p9, 1, 0 }
  0x10   : > { %p738_p10 = pneg %p1032_p9  ;;  %s142_s24 = sshll.u32 %s960_s23, 4  ;;  %s143_s24 = int_to_ptr.vmem [resolvable:$true] %s142_s24 }
  0x11   : > { %p821_p13 = scmp.ne.s32.totalorder %s133_s22, %s820_s26  ;;  %p828_p5 = scmp.lt.s32.totalorder %s133_s22, %s133_s22 }
  0x12   : > { %p1040_p11 = pnand %p738_p10, %p1221_p1  ;;  %p829_p7 = scmp.lt.s32.totalorder %s820_s26, %s820_s26 }
  0x14   : > { %p811_p12 = pneg %p1040_p11  ;;  %p830_p8 = por %p829_p7, %p828_p5 }
  0x16   : > { %p823_p0 = pnand %p821_p13, %p811_p12 }
  0x18   : > { %p824_p3 = pneg %p823_p0 }
  0x1a   : > { %p831_p2 = pnand %p830_p8, %p824_p3 }
  0x1c   : > { %834 = shalt.err (!%p831_p2)
}
  0x1d   : > { %741 = dma.hbm_to_vmem [thread:$0]  (!%p1040_p11), %s1218_s1, 128, %s133_s22, [#allocation8]  }
  0x1e   : > { %s846_s29 = scalar_lea.vmem %s143_s24, 3200  ;;  %p854_p13 = scmp.lt.s32.totalorder %s143_s24, %s143_s24 }
  0x1f   : > { %p847_p10 = scmp.ne.s32.totalorder %s143_s24, %s846_s29  ;;  %p855_p0 = scmp.lt.s32.totalorder %s846_s29, %s846_s29 }
  0x21   : > { %p849_p1 = pnand %p847_p10, %p811_p12  ;;  %p856_p4 = por %p855_p0, %p854_p13 }
  0x23   : > { %p850_p6 = pneg %p849_p1 }
  0x25   : > { %p857_p9 = pnand %p856_p4, %p850_p6 }
  0x27   : > { %860 = shalt.err (!%p857_p9)
}
  0x28   : > { %s961_s30 = smov 128   ;;  %s962_s4 = smov 8  }
  0x29   : > { %744 = dma.hbm_to_vmem [thread:$0]  (!%p1040_p11), %s1219_s2, 3200, %s143_s24, [#allocation8], %s961_s30, %s961_s30, %s962_s4  }
  0x2a   : > { %s1063_s7 = sadd.s32 1, %s957_s15   ;;  %s27_s8 = sadd.s32 1, %s953_s14 }
  0x2b   : > { %s24_s9 = ssub.s32 %s957_s15, %s1063_s7  ;;  %p34_p1 = scmp.ne.s32.totalorder %s953_s14, %s949_s13 }
  0x2c   : > { %p25_p2 = scmp.eq.s32.totalorder %s24_s9, 0  ;;  %p35_p4 = scmp.eq.s32.totalorder %s957_s15, 0 }
  0x2d   : > { %p1229_p6 = scmp.eq.s32.totalorder %s1012_s16, 3  ;;  %p755_p9 = scmp.lt.s32.totalorder %s957_s15, 4 }
  0x2e   : > { %s1079_s11 = scalar_select %p25_p2, %s953_s14, %s27_s8  }
  0x2f   : > { %p1073_p8 = por %p1229_p6, %p34_p1  ;;  %p36_p12 = por %p35_p4, %p34_p1 }
  0x30   : > { %s156_s17 = sand.u32 1, %s953_s14   ;;  %s627_s22 = sshll.u32 %s957_s15, 7 }
  0x31   : > { %s1230_s10 = scalar_select %p1073_p8, 1, 0 }
  0x32   : > { %s626_s21 = sshll.u32 %s156_s17, 3  ;;  %s1086_s25 = scalar_lea.hbm %s1217_s0, %s627_s22 }
  0x33   : > { %s160_s26 = scalar_lea.vmem [#allocation4], %s626_s21  ;;  %p1088_p11 = pnand %p755_p9, %p36_p12 }
  0x34   : > { %s167_s27 = sshll.u32 %s160_s26, 4  ;;  %s157_s29 = scalar_lea.sflag [#allocation5], %s156_s17  ;;  %s168_s27 = int_to_ptr.vmem [resolvable:$true] %s167_s27 }
  0x35   : > { %s861_s30 = scalar_lea.hbm %s1086_s25, 128  ;;  %p863_p5 = pneg %p1088_p11 }
  0x36   : > { %p862_p3 = scmp.ne.s32.totalorder %s1086_s25, %s861_s30  ;;  %s866_s6 = scalar_lea.hbm %s1217_s0, 512 }
  0x37   : > { %p867_p13 = scmp.lt.s32.totalorder %s1086_s25, %s1217_s0  ;;  %p868_p0 = scmp.lt.s32.totalorder %s866_s6, %s861_s30 }
  0x38   : > { %p864_p7 = pnand %p863_p5, %p862_p3 }
  0x39   : > { %p869_p1 = por %p868_p0, %p867_p13 }
  0x3a   : > { %p865_p10 = pneg %p864_p7 }
  0x3c   : > { %p870_p2 = pnand %p869_p1, %p865_p10 }
  0x3e   : > { %873 = shalt.err (!%p870_p2)
}
  0x3f   : > { %s874_s21 = scalar_lea.vmem %s168_s27, 128  ;;  %s963_s17 = smov [#allocation4]  }
  0x40   : > { %p875_p4 = scmp.ne.s32.totalorder %s168_s27, %s874_s21  ;;  %s879_s22 = sshll.u32 %s963_s17, 4  ;;  %s880_s22 = int_to_ptr.vmem [resolvable:$false] %s879_s22 }
  0x41   : > { %s881_s23 = scalar_lea.vmem %s880_s22, 256  ;;  %p882_p12 = scmp.lt.s32.totalorder %s168_s27, %s880_s22 }
  0x42   : > { %p877_p6 = pnand %p875_p4, %p863_p5  ;;  %p883_p3 = scmp.lt.s32.totalorder %s881_s23, %s874_s21 }
  0x44   : > { %p878_p9 = pneg %p877_p6  ;;  %p884_p7 = por %p883_p3, %p882_p12 }
  0x46   : > { %p885_p8 = pnand %p884_p7, %p878_p9 }
  0x48   : > { %888 = shalt.err (!%p885_p8)
}
  0x49   : > { %748 = dma.hbm_to_vmem [thread:$0]  (!%p1088_p11), %s1086_s25, 128, %s168_s27, %s157_s29  }
  0x4a   : > { %p1232_p10 = scmp.ne.s32.totalorder %s1227_s20, 0 }
  0x4b   : > { %s1109_s24 = sand.u32 (!%p1232_p10), 1, %s949_s13   ;;  %p1233_p5 = scmp.ne.s32.totalorder (!%p1232_p10), %s1225_s18, 0 }
  0x4c   : > { %176 = sbr.rel (%p1232_p10) target bundleno = 1140 (0x474), region = 32  ;;  %s629_s26 = sshll.u32 (!%p1232_p10), %s1109_s24, 3 }
  0x4d   : > { %s179_s30 = scalar_lea.sflag (!%p1232_p10), [#allocation5], %s1109_s24  ;;  %s1113_s4 = scalar_lea.vmem (!%p1232_p10), [#allocation4], %s629_s26 }
  0x51   : > { %932 = dma.done.wait (%p1233_p5), %s179_s30, 128  }
  0x52   : > { %934 = vsyncadd (%p1233_p5), %s179_s30, 4294967168  ;;  %p1234_p8 = scmp.eq.s32.totalorder %s1012_s16, 0 }
  0x54   : > { %936 = dma.done.wait (%p1234_p8), [#allocation8], 3328   ;;  %p1235_p11 = pmov %p1234_p8 }
  0x55   : > { %s1123_s20 = scalar_lea.vmem [#allocation10], %s629_s26  ;;  %p1236_p13 = scmp.ne.s32.totalorder %s1012_s16, 0 }
  0x56   : > { %938 = vsyncadd (%p1235_p11), [#allocation8], 4294963968  ;;  %s964_s25 = smov (!%p1236_p13), 96  }
  0x57   : > { %216 = sbr.rel (%p1236_p13) target bundleno = 209 (0xd1), region = 48 }
  0x5c   : > { %v220_v0 = vld [vmem:[#allocation7] sm:$0xff]  ;;  %vm218_vm0 = vcmask 261120  }
  0x5d   : > { %222 = vrot.lane.b32.xlu0 %v220_v0, %s964_s25  ;;  %219 = vst.msk [vmem:[#allocation2] sm:$0xff] %vm218_vm0, %v220_v0 }
  0xcf   : > { %v223_v1 = vpop.permute.xlu0 %222 }
  0xd0   : > { %225 = vst.msk [vmem:[#allocation3] sm:$0xff] %vm218_vm0, %v223_v1 }
  0xd1 PF: > { %v244_v2 = vld [vmem:[#allocation9 + $0x78] sm:$0xff]  ;;  %v965_v3 = vmov 0.0   ;;  %v243_v4 = vld [vmem:[#allocation9 + $0x70] sm:$0xff]  ;;  %vm966_vm1 = vmmov 0   ;;  %v242_v5 = vld [vmem:[#allocation9 + $0x68] sm:$0xff]  ;;  %vm249_vm2 = vcmask 261120  }
  0xd2   : > { %680 = vmatprep.subr.mxu1 %v965_v3  ;;  %669 = vmatprep.subr.mxu0 %v965_v3  ;;  %v248_v6 = vld [vmem:[#allocation9 + $0x98] sm:$0xff]  ;;  %v247_v7 = vld [vmem:[#allocation9 + $0x90] sm:$0xff]  ;;  %v241_v8 = vld [vmem:[#allocation9 + $0x60] sm:$0xff]  ;;  %s967_s18 = smov 64   ;;  %s968_s27 = smov 32   ;;  %vm516_vm3 = vcmask 1048320  }
  0xd3   : > { %681 = vmatpush3.msra.mxu1 %v244_v2  ;;  %677 = vmatprep.mubr.msk.f32.mxu0 %vm966_vm1, %v965_v3  ;;  %v246_v9 = vld [vmem:[#allocation9 + $0x88] sm:$0xff]  ;;  %v240_v10 = vld [vmem:[#allocation9 + $0x58] sm:$0xff]  ;;  %v245_v11 = vld [vmem:[#allocation9 + $0x80] sm:$0xff]  ;;  %s969_s28 = smov 96   ;;  %s639_s29 = sshll.u32 %s1012_s16, 7 }
  0xd4   : > { %682 = vmatprep.subr.mxu1 %v965_v3  ;;  %712 = vmatprep.mubr.msk.f32.mxu1 %vm966_vm1, %v965_v3  ;;  %v227_v12 = vld [vmem:[#allocation2] sm:$0xff]  ;;  %v239_v13 = vld [vmem:[#allocation9 + $0x50] sm:$0xff]  ;;  %v238_v14 = vld [vmem:[#allocation9 + $0x48] sm:$0xff]  ;;  %s532_s5 = sshll.u32 %s1123_s20, 4  ;;  %s1173_s9 = scalar_lea.hbm %s1220_s3, %s639_s29  ;;  %s1175_s5 = int_to_ptr.vmem [resolvable:$true] %s532_s5 }
  0xd5   : > { %683 = vmatpush3.msra.mxu1 %v243_v4  ;;  %670 = vmatpush3.msra.mxu0 %v248_v6  ;;  %v237_v15 = vld [vmem:[#allocation9 + $0x40] sm:$0xff]  ;;  %v236_v16 = vld [vmem:[#allocation9 + $0x38] sm:$0xff]  ;;  %v235_v17 = vld [vmem:[#allocation9 + $0x30] sm:$0xff]  ;;  %s519_s21 = scalar_lea.sflag [#allocation6], %s1109_s24  ;;  %s889_s16 = scalar_lea.vmem %s1175_s5, 128 }
  0xd6   : > { %684 = vmatprep.subr.mxu1 %v965_v3  ;;  %671 = vmatprep.subr.mxu0 %v965_v3  ;;  %v234_v18 = vld [vmem:[#allocation9 + $0x28] sm:$0xff]  ;;  %v233_v19 = vld [vmem:[#allocation9 + $0x20] sm:$0xff]  ;;  %v232_v20 = vld [vmem:[#allocation9 + $0x18] sm:$0xff]  ;;  %p890_p0 = scmp.ne.s32.totalorder %s1175_s5, %s889_s16  ;;  %p1237_p1 = scmp.ne.s32.totalorder %s1230_s10, 0 }
  0xd7   : > { %685 = vmatpush3.msra.mxu1 %v242_v5  ;;  %672 = vmatpush3.msra.mxu0 %v247_v7  ;;  %v231_v21 = vld [vmem:[#allocation9 + $0x10] sm:$0xff]  ;;  %v230_v22 = vld [vmem:[#allocation9 + $0x8] sm:$0xff]  ;;  %v229_v23 = vld [vmem:[#allocation9] sm:$0xff]  ;;  %s970_s17 = smov [#allocation10]  }
  0xd8   : > { %686 = vmatprep.subr.mxu1 %v965_v3  ;;  %673 = vmatprep.subr.mxu0 %v965_v3  ;;  %v226_v24 = vld [vmem:[%s1113_s4] sm:$0xff]  ;;  %v228_v31 = vld [vmem:[#allocation3] sm:$0xff]  ;;  %v434_v42 = vld [vmem:[#allocation9 + $0xb8] sm:$0xff]  ;;  %p891_p2 = pnand %p890_p0, %p1237_p1  ;;  %s893_s22 = sshll.u32 %s970_s17, 4  ;;  %s894_s22 = int_to_ptr.vmem [resolvable:$false] %s893_s22 }
  0xd9   : > { %687 = vmatpush3.msra.mxu1 %v241_v8  ;;  %674 = vmatpush3.msra.mxu0 %v246_v9  ;;  %v433_v43 = vld [vmem:[#allocation9 + $0xb0] sm:$0xff]  ;;  %v432_v44 = vld [vmem:[#allocation9 + $0xa8] sm:$0xff]  ;;  %v431_v45 = vld [vmem:[#allocation9 + $0xa0] sm:$0xff]  ;;  %s895_s23 = scalar_lea.vmem %s894_s22, 256  ;;  %p896_p6 = scmp.lt.s32.totalorder %s1175_s5, %s894_s22 }
  0xda   : > { %688 = vmatprep.subr.mxu1 %v965_v3  ;;  %675 = vmatprep.subr.mxu0 %v965_v3  ;;  %v636_v51 = vld [vmem:[#allocation9 + $0xc0] ss:$0 sm:$0xff]  ;;  %p892_p4 = pneg %p891_p2  ;;  %p897_p9 = scmp.lt.s32.totalorder %s895_s23, %s889_s16 }
  0xdb   : > { %689 = vmatpush3.msra.mxu1 %v240_v10  ;;  %676 = vmatpush3.msra.mxu0 %v245_v11 }
  0xdc   : > { %690 = vmatprep.subr.mxu1 %v965_v3  ;;  %678 = vmatmul.mubr.msk.f32.vlgmr.msra.gmra.mxu0 %vm249_vm2, %v227_v12  ;;  %p898_p12 = por %p897_p9, %p896_p6 }
  0xdd   : > { %691 = vmatpush3.msra.mxu1 %v239_v13  ;;  %715 = vmatprep.subr.mxu0 %v965_v3 }
  0xde   : > { %692 = vmatprep.subr.mxu1 %v965_v3  ;;  %723 = vmatprep.mubr.msk.f32.mxu0 %vm966_vm1, %v965_v3  ;;  %p899_p3 = pnand %p898_p12, %p892_p4 }
  0xdf   : > { %693 = vmatpush3.msra.mxu1 %v238_v14  ;;  %716 = vmatpush3.msra.mxu0 %v434_v42 }
  0xe0   : > { %694 = vmatprep.subr.mxu1 %v965_v3  ;;  %717 = vmatprep.subr.mxu0 %v965_v3 }
  0xe1   : > { %695 = vmatpush3.msra.mxu1 %v237_v15  ;;  %718 = vmatpush3.msra.mxu0 %v433_v43 }
  0xe2   : > { %696 = vmatprep.subr.mxu1 %v965_v3  ;;  %719 = vmatprep.subr.mxu0 %v965_v3 }
  0xe3   : > { %697 = vmatpush3.msra.mxu1 %v236_v16  ;;  %720 = vmatpush3.msra.mxu0 %v432_v44 }
  0xe4   : > { %698 = vmatprep.subr.mxu1 %v965_v3  ;;  %721 = vmatprep.subr.mxu0 %v965_v3 }
  0xe5   : > { %699 = vmatpush3.msra.mxu1 %v235_v17  ;;  %722 = vmatpush3.msra.mxu0 %v431_v45 }
  0xe6   : > { %700 = vmatprep.subr.mxu1 %v965_v3 }
  0xe7   : > { %701 = vmatpush3.msra.mxu1 %v234_v18 }
  0xe8   : > { %702 = vmatprep.subr.mxu1 %v965_v3 }
  0xe9   : > { %703 = vmatpush3.msra.mxu1 %v233_v19 }
  0xea   : > { %704 = vmatprep.subr.mxu1 %v965_v3 }
  0xeb   : > { %705 = vmatpush3.msra.mxu1 %v232_v20 }
  0xec   : > { %706 = vmatprep.subr.mxu1 %v965_v3 }
  0xed   : > { %707 = vmatpush3.msra.mxu1 %v231_v21 }
  0xee   : > { %708 = vmatprep.subr.mxu1 %v965_v3 }
  0xef   : > { %709 = vmatpush3.msra.mxu1 %v230_v22 }
  0xf0   : > { %710 = vmatprep.subr.mxu1 %v965_v3 }
  0xf1   : > { %711 = vmatpush3.msra.mxu1 %v229_v23 }
  0xf2   : > { %713 = vmatmul.mubr.f32.vlgmr.msra.gmra.mxu1 %v226_v24 }
 0x19c   : > { %v319_v25 = vpop.f32.mrf.mxu0 }
 0x19e   : > { %v679_v26 = vpop.f32.mrf.mxu0 }
 0x1b2   : > { %v389_v27 = vpop.f32.mrf.mxu1 }
 0x1b3   : > { %v390_v28 = vadd.f32 %v389_v27, %v319_v25 }
 0x1b4   : > { %v714_v29 = vpop.f32.mrf.mxu1 }
 0x1b5   : > { %801 = vtanh.f32 %v390_v28  ;;  %v635_v32 = vmul.f32 -1.442695, %v390_v28 }
 0x1b7   : > { %803 = vpow2.f32 %v635_v32 }
 0x1c2   : > { %v802_v30 = vpop.eup %801 }
 0x1c3   : > { %406 = vrot.lane.b32.xlu0 %v802_v30, %s967_s18 }
 0x1c4   : > { %v804_v33 = vpop.eup %803 }
 0x1c5   : > { %v396_v34 = vadd.f32 1.0, %v804_v33 }
 0x1c7   : > { %401 = vrot.lane.b32.xlu0 %v228_v31, %s968_s27  ;;  %805 = vrcp.f32 %v396_v34 }
 0x1d4   : > { %v806_v35 = vpop.eup %805 }
 0x235   : > { %v407_v36 = vpop.permute.xlu0 %406 }
 0x236   : > { %v409_v37 = vmul.f32 %v806_v35, %v407_v36 }
 0x238   : > { %411 = vrot.lane.b32.xlu1 %v409_v37, %s968_s27 }
 0x239   : > { %v402_v38 = vpop.permute.xlu0 %401 }
 0x23a   : > { %v404_v39 = vmul.f32 %v806_v35, %v402_v38 }
 0x2aa   : > { %v412_v40 = vpop.permute.xlu1 %411 }
 0x2ab   : > { %v414_v41 = vadd.f32 %v412_v40, %v404_v39 }
 0x2ad   : > { %807 = vtanh.f32 %v414_v41 }
 0x2ba   : > { %v808_v46 = vpop.eup %807 }
 0x2bb   : > { %417 = vrot.lane.b32.xlu1 %v808_v46, %s967_s18 }
 0x2bf   : > { %513 = vrot.lane.b32.xlu1 %v414_v41, %s967_s18 }
 0x32d   : > { %v418_v47 = vpop.permute.xlu1 %417 }
 0x32e   : > { %v420_v48 = vmul.f32 %v806_v35, %v418_v47 }
 0x330   : > { %422 = vrot.lane.b32.xlu0 %v420_v48, %s968_s27 }
 0x331   : > { %v514_v55 = vpop.permute.xlu1 %513 }
 0x334   : > { %427 = vrot.lane.b32.xlu0 %v414_v41, %s969_s28 }
 0x3a2   : > { %v423_v49 = vpop.permute.xlu0 %422 }
 0x3a3   : > { %425 = vst.msk [vmem:[#allocation2] sm:$0xff] %vm249_vm2, %v423_v49  ;;  %724 = vmatmul.mubr.msk.f32.vlgmr.msra.gmra.mxu0 %vm249_vm2, %v423_v49 }
 0x3a6   : > { %v428_v50 = vpop.permute.xlu0 %427 }
 0x3a7   : > { %430 = vst.msk [vmem:[#allocation3] sm:$0xff] %vm249_vm2, %v428_v50 }
 0x463   : > { %v508_v52 = vpop.f32.mrf.mxu0 }
 0x464   : > { %v509_v53 = vadd.f32 %v636_v51, %v508_v52 }
 0x465   : > { %v725_v54 = vpop.f32.mrf.mxu0 }
 0x466   : > { %512 = vst [vmem:[%s1123_s20] sm:$0xff] %v509_v53 }
 0x467   : > { %517 = vst.msk [vmem:[%s1123_s20] sm:$0xff] %vm516_vm3, %v514_v55 }
 0x468   : > { %902 = shalt.err (!%p899_p3)
}
 0x469   : > { %s903_s26 = scalar_lea.hbm %s1173_s9, 128  ;;  %s907_s4 = scalar_lea.hbm %s1220_s3, 512 }
 0x46a   : > { %p904_p7 = scmp.ne.s32.totalorder %s1173_s9, %s903_s26  ;;  %p908_p8 = scmp.lt.s32.totalorder %s1173_s9, %s1220_s3 }
 0x46b   : > { %p909_p11 = scmp.lt.s32.totalorder %s907_s4, %s903_s26 }
 0x46c   : > { %p905_p10 = pnand %p904_p7, %p1237_p1 }
 0x46d   : > { %p910_p13 = por %p909_p11, %p908_p8 }
 0x46e   : > { %p906_p5 = pneg %p905_p10 }
 0x470   : > { %p911_p0 = pnand %p910_p13, %p906_p5 }
 0x472   : > { %914 = shalt.err (!%p911_p0)
}
 0x473   : > { %736 = dma.vmem_to_hbm [thread:$0]  (%p1237_p1), %s1175_s5, 128, %s1173_s9, %s519_s21  }
 0x474 PF: > { %p758_p2 = scmp.ge.s32.totalorder %s957_s15, 2  ;;  %s544_s18 = sand.u32 1, %s945_s12  }
 0x475   : > { %p1238_p4 = scmp.ne.s32.totalorder %s1226_s19, 0  ;;  %s545_s27 = scalar_lea.sflag [#allocation6], %s544_s18 }
 0x477   : > { %p750_p6 = pnand %p758_p2, %p1238_p4 }
 0x479   : > { %p751_p9 = pneg %p750_p6 }
 0x47b   : > { %940 = dma.done.wait (%p751_p9), %s545_s27, 128  }
 0x47c   : > { %942 = vsyncadd (%p751_p9), %s545_s27, 4294967168  ;;  %p17_p12 = scmp.ge.s32.totalorder %s1063_s7, 6   ;;  %s1239_s12 = smov %s949_s13 }
 0x47d   : > { %s1240_s13 = smov %s953_s14  ;;  %s1241_s14 = smov %s1079_s11 }
 0x47e   : > { %s1242_s15 = smov %s1063_s7  ;;  %19 = sbr.rel (!%p17_p12) target bundleno = 6 (0x6), region = 89 }
 0x483   :  { %550 = vsyncpa [#allocation5], 1 }
 0x484   :  { %552 = vsyncpa [#allocation5 + $0x1], 1 }
 0x485   :  { %553 = vsyncpa [#allocation8], 1 }
 0x486   :  { %554 = vsyncpa [#allocation6], 1 }
 0x487   :  { %556 = vsyncpa [#allocation6 + $0x1], 1 }

</bundles_post_ra>
